<compile_context>
chip_gen: v7x
topology: tpu7x:2x2x1
jax: 0.10.0
libtpu: 0.0.40
codegen_flags: <defaults>
</compile_context>

<pallas_src>
import functools

import jax
import jax.numpy as jnp
import numpy as np
from jax.experimental import pallas as pl
from jax.experimental.pallas import tpu as pltpu

ALPHA = 0.7
BETA = 0.3
GAMMA = 4.0 / 3.0
SMOOTH = 1.0


def _loss_kernel(x_ref, t_ref, ce_ref, tp_ref, ps_ref, ts_ref,
                 *, hw, tile_p, tiles_per_split, num_classes, has_tail):
    """One (C, tile_p) pixel tile of one sample, one pixel-split half.

    Grid: (split, N, tiles_per_split).
    x_ref, t_ref : (C, tile_p)  logits / targets (any float dtype)
    ce_ref       : (1, 1)       running CE sum for this (half, sample)
    tp_ref       : (C, 1)       running sum of softmax * target
    ps_ref       : (C, 1)       running sum of softmax
    ts_ref       : (C, 1)       running sum of target
    """
    h = pl.program_id(0)          # pixel-split half
    i = pl.program_id(2)          # tile within this half

    @pl.when(i == 0)
    def _():
        ce_ref[...] = jnp.zeros_like(ce_ref)
        tp_ref[...] = jnp.zeros_like(tp_ref)
        ps_ref[...] = jnp.zeros_like(ps_ref)
        ts_ref[...] = jnp.zeros_like(ts_ref)

    tile_start = (h * tiles_per_split + i) * tile_p

    def accumulate(x, t, valid):
        # x, t: (C, tile_p) f32; valid: (1, tile_p) f32 or None for full tiles.
        # ---- softmax over the class (sublane) axis ----
        mx = jnp.max(x, axis=0, keepdims=True)
        ex = jnp.exp(x - mx)
        se = jnp.sum(ex, axis=0, keepdims=True)
        inv_se = pl.reciprocal(se, approx=False)      # one recip per pixel
        p = ex * inv_se

        # ---- cross entropy vs argmax(targets) (first-max tie-break) ----
        # ce = -(x[idx] - (mx + log(se)))  -- no full log-softmax temporary.
        cls = jax.lax.broadcasted_iota(jnp.int32, t.shape, 0)
        t_max = jnp.max(t, axis=0, keepdims=True)
        idx = jnp.min(jnp.where(t == t_max, cls, num_classes),
                      axis=0, keepdims=True)                    # (1, tile_p)
        onehot = (cls == idx).astype(jnp.float32)
        x_at = jnp.sum(onehot * x, axis=0, keepdims=True)       # (1, tile_p)
        ce_pix = (mx + jnp.log(se)) - x_at                       # (1, tile_p)

        if valid is not None:
            ce_pix = ce_pix * valid
            p = p * valid
            # `t` was already zeroed on invalid lanes by the caller.

        ce_ref[...] += jnp.sum(ce_pix, axis=1, keepdims=True)    # (1, 1)
        tp_ref[...] += jnp.sum(p * t, axis=1, keepdims=True)     # (C, 1)
        ps_ref[...] += jnp.sum(p, axis=1, keepdims=True)
        ts_ref[...] += jnp.sum(t, axis=1, keepdims=True)

    if not has_tail:
        # Statically known: every tile is fully inside H*W -> no masking ops.
        accumulate(x_ref[...].astype(jnp.float32),
                   t_ref[...].astype(jnp.float32), None)
    else:
        is_tail = tile_start + tile_p > hw

        @pl.when(jnp.logical_not(is_tail))
        def _():
            accumulate(x_ref[...].astype(jnp.float32),
                       t_ref[...].astype(jnp.float32), None)

        @pl.when(is_tail)
        def _():
            # Overhanging lanes (and whole tiles past H*W after the pixel-axis
            # split) contain undefined / stale data: zero them before any math.
            lane = jax.lax.broadcasted_iota(jnp.int32, (1, tile_p), 1)
            valid_b = (tile_start + lane) < hw                   # (1, tile_p)
            valid = valid_b.astype(jnp.float32)
            x = jnp.where(valid_b, x_ref[...].astype(jnp.float32), 0.0)
            t = jnp.where(valid_b, t_ref[...].astype(jnp.float32), 0.0)
            accumulate(x, t, valid)


def custom_loss(y_pr, mask, *, max_tile_p=None):
    """y_pr, mask: NCHW float arrays (mask one-hot-ish along C). Returns scalar."""
    N, C, H, W = y_pr.shape
    assert C > 1, "binary (C==1) sigmoid/BCE path not implemented"
    HW = H * W

    # Native-layout views (free reshapes, no transpose / no HBM copy).
    x = y_pr.reshape(N, C, HW)
    t = mask.reshape(N, C, HW)

    def _round_up(v, m):
        return -(-v // m) * m

    # Tile sizing: target ~1 MiB of f32 per input block (amortises the ~0.35 us
    # per-grid-step cost), lanes a multiple of 128, capped by the (rounded-up)
    # spatial extent and an optional user cap.
    target_block_bytes = 1 << 20
    lane_target = max(128, (target_block_bytes // (4 * C)) // 128 * 128)
    tile_p = int(min(lane_target, _round_up(HW, 128)))
    if max_tile_p is not None:
        tile_p = int(min(tile_p, max(128, (max_tile_p // 128) * 128)))
    num_tiles = -(-HW // tile_p)

    # Pixel-axis split so both v7x TensorCores get work even at small N.
    split = 2 if num_tiles >= 2 else 1
    tiles_per_split = -(-num_tiles // split)
    # A tail (masked) tile exists if the last real tile overhangs H*W, or the
    # split rounds up and produces tiles entirely past H*W.
    has_tail = (HW % tile_p != 0) or (split * tiles_per_split != num_tiles)

    kernel = functools.partial(
        _loss_kernel, hw=HW, tile_p=tile_p, tiles_per_split=tiles_per_split,
        num_classes=C, has_tail=has_tail)

    # Clamp the input tile index so over-split halves never DMA out of bounds;
    # the in-kernel mask (computed from the *unclamped* global index) zeroes
    # any contribution from such tiles.
    def in_map(h, n, i):
        return (n, 0, jnp.minimum(h * tiles_per_split + i, num_tiles - 1))

    out_shapes = (
        jax.ShapeDtypeStruct((split, N, 1, 1), jnp.float32),   # CE sum
        jax.ShapeDtypeStruct((split, N, C, 1), jnp.float32),   # sum(p * t)
        jax.ShapeDtypeStruct((split, N, C, 1), jnp.float32),   # sum(p)
        jax.ShapeDtypeStruct((split, N, C, 1), jnp.float32),   # sum(t)
    )

    # VMEM budget: 2 inputs x 2 buffers x block + ~12 f32 (C, tile_p)
    # temporaries + slack; clamp to [32 MiB, 48 MiB] (under v7x's 64 MiB/TC).
    in_block_bytes = C * tile_p * (np.dtype(y_pr.dtype).itemsize
                                   + np.dtype(mask.dtype).itemsize)
    f32_block = 4 * C * tile_p
    vmem_limit = int(min(max(2 * in_block_bytes + 12 * f32_block + (4 << 20),
                             32 << 20), 48 << 20))

    itemsize_in = np.dtype(y_pr.dtype).itemsize + np.dtype(mask.dtype).itemsize
    cost = pl.CostEstimate(
        flops=int(14 * N * C * HW),
        transcendentals=int(N * HW * (C + 2)),   # exp per (c,pix), log+recip per pix
        bytes_accessed=int(N * C * HW * itemsize_in + 4 * split * N * C * 4),
    )

    ce_out, tp_out, ps_out, ts_out = pl.pallas_call(
        kernel,
        out_shape=out_shapes,
        grid_spec=pltpu.PrefetchScalarGridSpec(
            num_scalar_prefetch=0,
            grid=(split, N, tiles_per_split),
            in_specs=[
                pl.BlockSpec((None, C, tile_p), in_map),
                pl.BlockSpec((None, C, tile_p), in_map),
            ],
            out_specs=[
                pl.BlockSpec((None, None, 1, 1), lambda h, n, i: (h, n, 0, 0)),
                pl.BlockSpec((None, None, C, 1), lambda h, n, i: (h, n, 0, 0)),
                pl.BlockSpec((None, None, C, 1), lambda h, n, i: (h, n, 0, 0)),
                pl.BlockSpec((None, None, C, 1), lambda h, n, i: (h, n, 0, 0)),
            ],
        ),
        compiler_params=pltpu.CompilerParams(
            dimension_semantics=("parallel", "parallel", "arbitrary"),
            vmem_limit_bytes=vmem_limit),
        cost_estimate=cost,
    )(x, t)

    # Tiny final algebra (split*N*C*4 floats) in plain JAX.
    ce_mean = ce_out.sum() / float(N * HW)
    tp = tp_out.sum(axis=(0, 1))[:, 0]
    ps = ps_out.sum(axis=(0, 1))[:, 0]
    ts = ts_out.sum(axis=(0, 1))[:, 0]
    fp = ps - tp
    fn = ts - tp
    score = (tp + SMOOTH) / (tp + ALPHA * fp + BETA * fn + SMOOTH)
    # Clamp guards tiny negative fp residuals; analytically score <= 1.
    ft = jnp.maximum(1.0 - score, 0.0) ** GAMMA
    return ce_mean + ft.mean()


def _ref_loss(y_pr, mask):
    """Pure-JAX reference matching the PyTorch forward (ignore=None, C>1)."""
    labels = jnp.argmax(mask, axis=1)                       # (N,H,W)
    logp = jax.nn.log_softmax(y_pr, axis=1)
    ce = -jnp.take_along_axis(logp, labels[:, None], axis=1)[:, 0]
    ce_mean = ce.mean()
    p = jax.nn.softmax(y_pr, axis=1)
    tp = (p * mask).sum(axis=(0, 2, 3))
    fp = p.sum(axis=(0, 2, 3)) - tp
    fn = mask.sum(axis=(0, 2, 3)) - tp
    score = (tp + SMOOTH) / (tp + ALPHA * fp + BETA * fn + SMOOTH)
    ft = (1.0 - score) ** GAMMA
    return ce_mean + ft.mean()


if __name__ == "__main__":
    key = jax.random.PRNGKey(0)
    k1, k2, k3, k4, k5, k6 = jax.random.split(key, 6)

    # 1) Primary small test: HW divisible by 128 -> statically no tail path.
    N, C, H, W = 2, 4, 16, 16
    y_pr = jax.random.normal(k1, (N, C, H, W), dtype=jnp.float32)
    labels = jax.random.randint(k2, (N, H, W), 0, C)
    mask = jax.nn.one_hot(labels, C, axis=1, dtype=jnp.float32)   # NCHW one-hot
    loss = jax.block_until_ready(custom_loss(y_pr, mask))
    ref = jax.block_until_ready(_ref_loss(y_pr, mask))
    np.testing.assert_allclose(np.asarray(loss), np.asarray(ref),
                               rtol=1e-5, atol=1e-5)

    # 2) Ragged spatial size: exercises the masked tail tile (HW=130 < tile).
    N2, C2, H2, W2 = 2, 3, 10, 13
    y2 = jax.random.normal(k3, (N2, C2, H2, W2), dtype=jnp.float32)
    l2 = jax.random.randint(k4, (N2, H2, W2), 0, C2)
    m2 = jax.nn.one_hot(l2, C2, axis=1, dtype=jnp.float32)
    loss2 = jax.block_until_ready(custom_loss(y2, m2))
    ref2 = jax.block_until_ready(_ref_loss(y2, m2))
    np.testing.assert_allclose(np.asarray(loss2), np.asarray(ref2),
                               rtol=1e-5, atol=1e-5)

    # 3) Multi-tile + pixel split: small max_tile_p forces 3 tiles -> split=2,
    #    one tail tile and one fully-out-of-range (clamped, masked) tile.
    N3, C3, H3, W3 = 2, 4, 16, 80
    y3 = jax.random.normal(k5, (N3, C3, H3, W3), dtype=jnp.float32)
    l3 = jax.random.randint(k6, (N3, H3, W3), 0, C3)
    m3 = jax.nn.one_hot(l3, C3, axis=1, dtype=jnp.float32)
    loss3 = jax.block_until_ready(custom_loss(y3, m3, max_tile_p=512))
    ref3 = jax.block_until_ready(_ref_loss(y3, m3))
    np.testing.assert_allclose(np.asarray(loss3), np.asarray(ref3),
                               rtol=2e-5, atol=2e-5)

    print("KERNEL_OK")
</pallas_src>

<mosaic_0001>
module attributes {stable_mosaic.version = 11 : i64} {
  func.func @_loss_kernel(%arg0: i32, %arg1: i32, %arg2: i32, %arg3: memref<1x4x256xf32, #tpu.memory_space<vmem>>, %arg4: memref<1x4x256xf32, #tpu.memory_space<vmem>>, %arg5: memref<1x1x1x1xf32, #tpu.memory_space<vmem>>, %arg6: memref<1x1x4x1xf32, #tpu.memory_space<vmem>>, %arg7: memref<1x1x4x1xf32, #tpu.memory_space<vmem>>, %arg8: memref<1x1x4x1xf32, #tpu.memory_space<vmem>>) attributes {dimension_semantics = [#tpu.dimension_semantics<parallel>, #tpu.dimension_semantics<parallel>, #tpu.dimension_semantics<arbitrary>], iteration_bounds = array<i64: 1, 2, 1>, scalar_prefetch = 0 : i64, scratch_operands = 0 : i64, tpu.core_type = #tpu.core_type<tc>, window_params = [{transform_indices = @transform_0, window_bounds = array<i64: 1, 4, 256>}, {transform_indices = @transform_1, window_bounds = array<i64: 1, 4, 256>}, {transform_indices = @transform_2, window_bounds = array<i64: 1, 1, 1, 1>}, {transform_indices = @transform_3, window_bounds = array<i64: 1, 1, 4, 1>}, {transform_indices = @transform_4, window_bounds = array<i64: 1, 1, 4, 1>}, {transform_indices = @transform_5, window_bounds = array<i64: 1, 1, 4, 1>}]} {
    %c0_i32 = arith.constant 0 : i32
    %0 = arith.cmpi eq, %arg2, %c0_i32 : i32
    %1 = arith.extui %0 : i1 to i32
    %c0_i32_0 = arith.constant 0 : i32
    %2 = arith.cmpi ne, %1, %c0_i32_0 : i32
    scf.if %2 {
      %cst_46 = arith.constant 0.000000e+00 : f32
      %69 = vector.broadcast %cst_46 : f32 to vector<1x1xf32>
      %c0_47 = arith.constant 0 : index
      %c0_48 = arith.constant 0 : index
      %c0_49 = arith.constant 0 : index
      %c0_50 = arith.constant 0 : index
      %70 = vector.load %arg5[%c0_47, %c0_48, %c0_49, %c0_50] : memref<1x1x1x1xf32, #tpu.memory_space<vmem>>, vector<1x1x1x1xf32>
      %71 = vector.shape_cast %70 : vector<1x1x1x1xf32> to vector<1x1xf32>
      %72 = vector.shape_cast %69 : vector<1x1xf32> to vector<1x1x1x1xf32>
      tpu.vector_store %arg5[%c0_47, %c0_48, %c0_49, %c0_50], %72 {strides = array<i32>} : memref<1x1x1x1xf32, #tpu.memory_space<vmem>>, vector<1x1x1x1xf32>,
      %cst_51 = arith.constant 0.000000e+00 : f32
      %73 = vector.broadcast %cst_51 : f32 to vector<4x1xf32>
      %c0_52 = arith.constant 0 : index
      %c0_53 = arith.constant 0 : index
      %c0_54 = arith.constant 0 : index
      %c0_55 = arith.constant 0 : index
      %74 = vector.load %arg6[%c0_52, %c0_53, %c0_54, %c0_55] : memref<1x1x4x1xf32, #tpu.memory_space<vmem>>, vector<1x1x4x1xf32>
      %75 = vector.shape_cast %74 : vector<1x1x4x1xf32> to vector<4x1xf32>
      %76 = vector.shape_cast %73 : vector<4x1xf32> to vector<1x1x4x1xf32>
      tpu.vector_store %arg6[%c0_52, %c0_53, %c0_54, %c0_55], %76 {strides = array<i32>} : memref<1x1x4x1xf32, #tpu.memory_space<vmem>>, vector<1x1x4x1xf32>,
      %cst_56 = arith.constant 0.000000e+00 : f32
      %77 = vector.broadcast %cst_56 : f32 to vector<4x1xf32>
      %c0_57 = arith.constant 0 : index
      %c0_58 = arith.constant 0 : index
      %c0_59 = arith.constant 0 : index
      %c0_60 = arith.constant 0 : index
      %78 = vector.load %arg7[%c0_57, %c0_58, %c0_59, %c0_60] : memref<1x1x4x1xf32, #tpu.memory_space<vmem>>, vector<1x1x4x1xf32>
      %79 = vector.shape_cast %78 : vector<1x1x4x1xf32> to vector<4x1xf32>
      %80 = vector.shape_cast %77 : vector<4x1xf32> to vector<1x1x4x1xf32>
      tpu.vector_store %arg7[%c0_57, %c0_58, %c0_59, %c0_60], %80 {strides = array<i32>} : memref<1x1x4x1xf32, #tpu.memory_space<vmem>>, vector<1x1x4x1xf32>,
      %cst_61 = arith.constant 0.000000e+00 : f32
      %81 = vector.broadcast %cst_61 : f32 to vector<4x1xf32>
      %c0_62 = arith.constant 0 : index
      %c0_63 = arith.constant 0 : index
      %c0_64 = arith.constant 0 : index
      %c0_65 = arith.constant 0 : index
      %82 = vector.load %arg8[%c0_62, %c0_63, %c0_64, %c0_65] : memref<1x1x4x1xf32, #tpu.memory_space<vmem>>, vector<1x1x4x1xf32>
      %83 = vector.shape_cast %82 : vector<1x1x4x1xf32> to vector<4x1xf32>
      %84 = vector.shape_cast %81 : vector<4x1xf32> to vector<1x1x4x1xf32>
      tpu.vector_store %arg8[%c0_62, %c0_63, %c0_64, %c0_65], %84 {strides = array<i32>} : memref<1x1x4x1xf32, #tpu.memory_space<vmem>>, vector<1x1x4x1xf32>,
    } else {
    }
    %c0 = arith.constant 0 : index
    %c0_1 = arith.constant 0 : index
    %c0_2 = arith.constant 0 : index
    %3 = vector.load %arg3[%c0, %c0_1, %c0_2] : memref<1x4x256xf32, #tpu.memory_space<vmem>>, vector<1x4x256xf32>
    %4 = vector.shape_cast %3 : vector<1x4x256xf32> to vector<4x256xf32>
    %c0_3 = arith.constant 0 : index
    %c0_4 = arith.constant 0 : index
    %c0_5 = arith.constant 0 : index
    %5 = vector.load %arg4[%c0_3, %c0_4, %c0_5] : memref<1x4x256xf32, #tpu.memory_space<vmem>>, vector<1x4x256xf32>
    %6 = vector.shape_cast %5 : vector<1x4x256xf32> to vector<4x256xf32>
    %cst = arith.constant dense<0xFF800000> : vector<256xf32>
    %7 = vector.multi_reduction <maximumf>, %4, %cst [0] : vector<4x256xf32> to vector<256xf32>
    %8 = vector.shape_cast %7 : vector<256xf32> to vector<1x256xf32>
    %9 = vector.broadcast %8 : vector<1x256xf32> to vector<4x256xf32>
    %10 = arith.subf %4, %9 : vector<4x256xf32>
    %11 = math.exp %10 : vector<4x256xf32>
    %cst_6 = arith.constant dense<0.000000e+00> : vector<256xf32>
    %12 = vector.multi_reduction <add>, %11, %cst_6 [0] : vector<4x256xf32> to vector<256xf32>
    %13 = vector.shape_cast %12 : vector<256xf32> to vector<1x256xf32>
    %14 = tpu.reciprocal %13 : vector<1x256xf32> -> vector<1x256xf32>
    %15 = vector.broadcast %14 : vector<1x256xf32> to vector<4x256xf32>
    %16 = arith.mulf %11, %15 : vector<4x256xf32>
    %17 = tpu.iota {dimensions = array<i32: 0>} : vector<4x256xi32>
    %cst_7 = arith.constant dense<0xFF800000> : vector<256xf32>
    %18 = vector.multi_reduction <maximumf>, %6, %cst_7 [0] : vector<4x256xf32> to vector<256xf32>
    %19 = vector.shape_cast %18 : vector<256xf32> to vector<1x256xf32>
    %20 = vector.broadcast %19 : vector<1x256xf32> to vector<4x256xf32>
    %21 = arith.cmpf oeq, %6, %20 : vector<4x256xf32>
    %c4_i32 = arith.constant 4 : i32
    %22 = vector.broadcast %c4_i32 : i32 to vector<4x256xi32>
    %23 = arith.select %21, %17, %22 : vector<4x256xi1>, vector<4x256xi32>
    %cst_8 = arith.constant dense<2147483647> : vector<256xi32>
    %24 = vector.multi_reduction <minsi>, %23, %cst_8 [0] : vector<4x256xi32> to vector<256xi32>
    %25 = vector.shape_cast %24 : vector<256xi32> to vector<1x256xi32>
    %26 = vector.broadcast %25 : vector<1x256xi32> to vector<4x256xi32>
    %27 = arith.cmpi eq, %17, %26 : vector<4x256xi32>
    %28 = arith.extui %27 : vector<4x256xi1> to vector<4x256xi32>
    %29 = arith.sitofp %28 : vector<4x256xi32> to vector<4x256xf32>
    %30 = arith.mulf %29, %4 : vector<4x256xf32>
    %cst_9 = arith.constant dense<0.000000e+00> : vector<256xf32>
    %31 = vector.multi_reduction <add>, %30, %cst_9 [0] : vector<4x256xf32> to vector<256xf32>
    %32 = vector.shape_cast %31 : vector<256xf32> to vector<1x256xf32>
    %33 = math.log %13 : vector<1x256xf32>
    %34 = arith.addf %8, %33 : vector<1x256xf32>
    %35 = arith.subf %34, %32 : vector<1x256xf32>
    %c0_10 = arith.constant 0 : index
    %c0_11 = arith.constant 0 : index
    %c0_12 = arith.constant 0 : index
    %c0_13 = arith.constant 0 : index
    %36 = vector.load %arg5[%c0_10, %c0_11, %c0_12, %c0_13] : memref<1x1x1x1xf32, #tpu.memory_space<vmem>>, vector<1x1x1x1xf32>
    %37 = vector.shape_cast %36 : vector<1x1x1x1xf32> to vector<1x1xf32>
    %cst_14 = arith.constant dense<0.000000e+00> : vector<1xf32>
    %38 = vector.multi_reduction <add>, %35, %cst_14 [1] : vector<1x256xf32> to vector<1xf32>
    %39 = vector.shape_cast %38 : vector<1xf32> to vector<1x1xf32>
    %40 = arith.addf %37, %39 : vector<1x1xf32>
    %c0_15 = arith.constant 0 : index
    %c0_16 = arith.constant 0 : index
    %c0_17 = arith.constant 0 : index
    %c0_18 = arith.constant 0 : index
    %41 = vector.load %arg5[%c0_15, %c0_16, %c0_17, %c0_18] : memref<1x1x1x1xf32, #tpu.memory_space<vmem>>, vector<1x1x1x1xf32>
    %42 = vector.shape_cast %41 : vector<1x1x1x1xf32> to vector<1x1xf32>
    %43 = vector.shape_cast %40 : vector<1x1xf32> to vector<1x1x1x1xf32>
    tpu.vector_store %arg5[%c0_15, %c0_16, %c0_17, %c0_18], %43 {strides = array<i32>} : memref<1x1x1x1xf32, #tpu.memory_space<vmem>>, vector<1x1x1x1xf32>,
    %c0_19 = arith.constant 0 : index
    %c0_20 = arith.constant 0 : index
    %c0_21 = arith.constant 0 : index
    %c0_22 = arith.constant 0 : index
    %44 = vector.load %arg6[%c0_19, %c0_20, %c0_21, %c0_22] : memref<1x1x4x1xf32, #tpu.memory_space<vmem>>, vector<1x1x4x1xf32>
    %45 = vector.shape_cast %44 : vector<1x1x4x1xf32> to vector<4x1xf32>
    %46 = arith.mulf %16, %6 : vector<4x256xf32>
    %cst_23 = arith.constant dense<0.000000e+00> : vector<4xf32>
    %47 = vector.multi_reduction <add>, %46, %cst_23 [1] : vector<4x256xf32> to vector<4xf32>
    %48 = vector.shape_cast %47 : vector<4xf32> to vector<4x1xf32>
    %49 = arith.addf %45, %48 : vector<4x1xf32>
    %c0_24 = arith.constant 0 : index
    %c0_25 = arith.constant 0 : index
    %c0_26 = arith.constant 0 : index
    %c0_27 = arith.constant 0 : index
    %50 = vector.load %arg6[%c0_24, %c0_25, %c0_26, %c0_27] : memref<1x1x4x1xf32, #tpu.memory_space<vmem>>, vector<1x1x4x1xf32>
    %51 = vector.shape_cast %50 : vector<1x1x4x1xf32> to vector<4x1xf32>
    %52 = vector.shape_cast %49 : vector<4x1xf32> to vector<1x1x4x1xf32>
    tpu.vector_store %arg6[%c0_24, %c0_25, %c0_26, %c0_27], %52 {strides = array<i32>} : memref<1x1x4x1xf32, #tpu.memory_space<vmem>>, vector<1x1x4x1xf32>,
    %c0_28 = arith.constant 0 : index
    %c0_29 = arith.constant 0 : index
    %c0_30 = arith.constant 0 : index
    %c0_31 = arith.constant 0 : index
    %53 = vector.load %arg7[%c0_28, %c0_29, %c0_30, %c0_31] : memref<1x1x4x1xf32, #tpu.memory_space<vmem>>, vector<1x1x4x1xf32>
    %54 = vector.shape_cast %53 : vector<1x1x4x1xf32> to vector<4x1xf32>
    %cst_32 = arith.constant dense<0.000000e+00> : vector<4xf32>
    %55 = vector.multi_reduction <add>, %16, %cst_32 [1] : vector<4x256xf32> to vector<4xf32>
    %56 = vector.shape_cast %55 : vector<4xf32> to vector<4x1xf32>
    %57 = arith.addf %54, %56 : vector<4x1xf32>
    %c0_33 = arith.constant 0 : index
    %c0_34 = arith.constant 0 : index
    %c0_35 = arith.constant 0 : index
    %c0_36 = arith.constant 0 : index
    %58 = vector.load %arg7[%c0_33, %c0_34, %c0_35, %c0_36] : memref<1x1x4x1xf32, #tpu.memory_space<vmem>>, vector<1x1x4x1xf32>
    %59 = vector.shape_cast %58 : vector<1x1x4x1xf32> to vector<4x1xf32>
    %60 = vector.shape_cast %57 : vector<4x1xf32> to vector<1x1x4x1xf32>
    tpu.vector_store %arg7[%c0_33, %c0_34, %c0_35, %c0_36], %60 {strides = array<i32>} : memref<1x1x4x1xf32, #tpu.memory_space<vmem>>, vector<1x1x4x1xf32>,
    %c0_37 = arith.constant 0 : index
    %c0_38 = arith.constant 0 : index
    %c0_39 = arith.constant 0 : index
    %c0_40 = arith.constant 0 : index
    %61 = vector.load %arg8[%c0_37, %c0_38, %c0_39, %c0_40] : memref<1x1x4x1xf32, #tpu.memory_space<vmem>>, vector<1x1x4x1xf32>
    %62 = vector.shape_cast %61 : vector<1x1x4x1xf32> to vector<4x1xf32>
    %cst_41 = arith.constant dense<0.000000e+00> : vector<4xf32>
    %63 = vector.multi_reduction <add>, %6, %cst_41 [1] : vector<4x256xf32> to vector<4xf32>
    %64 = vector.shape_cast %63 : vector<4xf32> to vector<4x1xf32>
    %65 = arith.addf %62, %64 : vector<4x1xf32>
    %c0_42 = arith.constant 0 : index
    %c0_43 = arith.constant 0 : index
    %c0_44 = arith.constant 0 : index
    %c0_45 = arith.constant 0 : index
    %66 = vector.load %arg8[%c0_42, %c0_43, %c0_44, %c0_45] : memref<1x1x4x1xf32, #tpu.memory_space<vmem>>, vector<1x1x4x1xf32>
    %67 = vector.shape_cast %66 : vector<1x1x4x1xf32> to vector<4x1xf32>
    %68 = vector.shape_cast %65 : vector<4x1xf32> to vector<1x1x4x1xf32>
    tpu.vector_store %arg8[%c0_42, %c0_43, %c0_44, %c0_45], %68 {strides = array<i32>} : memref<1x1x4x1xf32, #tpu.memory_space<vmem>>, vector<1x1x4x1xf32>,
    return
  }
  func.func @transform_0(%arg0: i32, %arg1: i32, %arg2: i32) -> (i32, i32, i32) {
    %c1_i32 = arith.constant 1 : i32
    %0 = arith.muli %arg0, %c1_i32 : i32
    %1 = arith.addi %0, %arg2 : i32
    %c0_i32 = arith.constant 0 : i32
    %2 = arith.minsi %1, %c0_i32 : i32
    %c0_i32_0 = arith.constant 0 : i32
    %c0_i32_1 = arith.constant 0 : i32
    return %arg1, %c0_i32_0, %2 : i32, i32, i32
  }
  func.func @transform_1(%arg0: i32, %arg1: i32, %arg2: i32) -> (i32, i32, i32) {
    %c1_i32 = arith.constant 1 : i32
    %0 = arith.muli %arg0, %c1_i32 : i32
    %1 = arith.addi %0, %arg2 : i32
    %c0_i32 = arith.constant 0 : i32
    %2 = arith.minsi %1, %c0_i32 : i32
    %c0_i32_0 = arith.constant 0 : i32
    %c0_i32_1 = arith.constant 0 : i32
    return %arg1, %c0_i32_0, %2 : i32, i32, i32
  }
  func.func @transform_2(%arg0: i32, %arg1: i32, %arg2: i32) -> (i32, i32, i32, i32) {
    %c0_i32 = arith.constant 0 : i32
    %c0_i32_0 = arith.constant 0 : i32
    %c0_i32_1 = arith.constant 0 : i32
    return %arg0, %arg1, %c0_i32, %c0_i32_0 : i32, i32, i32, i32
  }
  func.func @transform_3(%arg0: i32, %arg1: i32, %arg2: i32) -> (i32, i32, i32, i32) {
    %c0_i32 = arith.constant 0 : i32
    %c0_i32_0 = arith.constant 0 : i32
    %c0_i32_1 = arith.constant 0 : i32
    return %arg0, %arg1, %c0_i32, %c0_i32_0 : i32, i32, i32, i32
  }
  func.func @transform_4(%arg0: i32, %arg1: i32, %arg2: i32) -> (i32, i32, i32, i32) {
    %c0_i32 = arith.constant 0 : i32
    %c0_i32_0 = arith.constant 0 : i32
    %c0_i32_1 = arith.constant 0 : i32
    return %arg0, %arg1, %c0_i32, %c0_i32_0 : i32, i32, i32, i32
  }
  func.func @transform_5(%arg0: i32, %arg1: i32, %arg2: i32) -> (i32, i32, i32, i32) {
    %c0_i32 = arith.constant 0 : i32
    %c0_i32_0 = arith.constant 0 : i32
    %c0_i32_1 = arith.constant 0 : i32
    return %arg0, %arg1, %c0_i32, %c0_i32_0 : i32, i32, i32, i32
  }
}

</mosaic_0001>

<bundles_post_ra>
// kernel: tpu_custom_call.1
= control target key start
LH: loop header
LB: loop body
LE: loop exit
PB: predicated region body
PF: predicated region fallthrough
CT: control target
= control target key end

     0   :  { %11 = vsyncpa [#allocation3], 0  ;;  %s1337_s0 = inlined_call_operand.hbm [shape: f32[2,4,256], index: 0, kind: input, shape index: {}]   ;;  %s1338_s1 = inlined_call_operand.hbm [shape: f32[2,4,256], index: 1, kind: input, shape index: {}]   ;;  %s1339_s2 = inlined_call_operand.vmem [shape: f32[1,2,1,1], index: 2, kind: output, shape index: {0}]   ;;  %s1340_s3 = inlined_call_operand.vmem [shape: f32[1,2,4,1], index: 3, kind: output, shape index: {1}]   ;;  %s1341_s4 = inlined_call_operand.vmem [shape: f32[1,2,4,1], index: 4, kind: output, shape index: {2}]   ;;  %s1342_s5 = inlined_call_operand.vmem [shape: f32[1,2,4,1], index: 5, kind: output, shape index: {3}]  }
   0x1   :  { %13 = vsyncpa [#allocation3 + $0x1], 0 }
   0x2   :  { %14 = vsyncpa [#allocation5], 0 }
   0x3   :  { %16 = vsyncpa [#allocation5 + $0x1], 0  ;;  %s1086_s18 = smov 0   ;;  %s1088_s19 = smov 0  }
   0x4   :  { %s1090_s20 = smov 0   ;;  %s1092_s21 = smov 0  }
   0x5   :  { %s1094_s22 = smov 0   ;;  %s1096_s23 = smov 0  }
   0x6 LB: > { %s840_s24 = sadd.s32 4294967295, %s1050_s23   ;;  %s37_s25 = sadd.s32 1, %s1046_s22  ;;  %s1050_s23 = sphi %s1096_s23, %s22_s23   ;;  %s1046_s22 = sphi %s1094_s22, %s1356_s22   ;;  %s1042_s21 = sphi %s1092_s21, %s1355_s21   ;;  %s1038_s20 = sphi %s1090_s20, %s1354_s20   ;;  %s1034_s19 = sphi %s1088_s19, %s1353_s19   ;;  %s1030_s18 = sphi %s1086_s18, %s1352_s18  }
   0x7   : > { %p39_p0 = scmp.ge.s32.totalorder %s37_s25, 2  ;;  %s56_s26 = sadd.s32 1, %s1038_s20 }
   0x8   : > { %p63_p1 = scmp.ne.s32.totalorder %s1038_s20, %s1034_s19  ;;  %p64_p2 = scmp.eq.s32.totalorder %s1050_s23, 0 }
   0x9   : > { %s1358_s25 = smov (%p39_p0, %s37_s25), 0  ;;  %p69_p4 = scmp.ne.s32.totalorder %s1034_s19, %s1030_s18 }
   0xa   : > { %p1122_p3 = por %p64_p2, %p63_p1  ;;  %s51_s28 = ssub.s32 %s1046_s22, %s1358_s25 }
   0xb   : > { %p70_p5 = scmp.eq.s32.totalorder %s840_s24, 0  ;;  %p54_p6 = scmp.eq.s32.totalorder %s51_s28, 0 }
   0xc   : > { %p873_p8 = scmp.lt.s32.totalorder %s1050_s23, 2  ;;  %s1138_s6 = sand.u32 1, %s1038_s20  }
   0xd   : > { %p1129_p7 = por %p70_p5, %p69_p4  ;;  %s860_s7 = sshll.u32 %s1046_s22, 7 }
   0xe   : > { %s1135_s30 = scalar_select %p54_p6, %s1038_s20, %s56_s26  }
   0xf   : > { %s1345_s29 = scalar_select %p1129_p7, 1, 0 }
  0x10   : > { %s844_s8 = sshll.u32 %s1138_s6, 3  ;;  %s1147_s11 = scalar_lea.hbm %s1337_s0, %s860_s7 }
  0x11   : > { %s243_s12 = scalar_lea.vmem [#allocation2], %s844_s8  ;;  %p1153_p9 = pnand %p873_p8, %p1122_p3 }
  0x12   : > { %s256_s13 = sshll.u32 %s243_s12, 4  ;;  %s240_s15 = scalar_lea.sflag [#allocation3], %s1138_s6  ;;  %s1157_s13 = int_to_ptr.vmem [resolvable:$true] %s256_s13 }
  0x13   : > { %s936_s16 = scalar_lea.hbm %s1147_s11, 128  ;;  %p938_p13 = pneg %p1153_p9 }
  0x14   : > { %p937_p12 = scmp.ne.s32.totalorder %s1147_s11, %s936_s16  ;;  %s941_s24 = scalar_lea.hbm %s1337_s0, 256 }
  0x15   : > { %p942_p2 = scmp.lt.u32.totalorder %s1147_s11, %s1337_s0  ;;  %p943_p3 = scmp.lt.u32.totalorder %s941_s24, %s936_s16 }
  0x16   : > { %p939_p0 = pnand %p938_p13, %p937_p12  ;;  %p945_p5 = scmp.lt.u32.totalorder %s936_s16, %s1147_s11 }
  0x17   : > { %p944_p4 = por %p943_p3, %p942_p2 }
  0x18   : > { %p940_p1 = pneg %p939_p0 }
  0x19   : > { %p946_p6 = por %p945_p5, %p944_p4 }
  0x1b   : > { %p947_p8 = pnand %p946_p6, %p940_p1 }
  0x1d   : > { %950 = shalt.err (!%p947_p8)
}
  0x1e   : > { %s951_s28 = scalar_lea.vmem %s1157_s13, 128  ;;  %s1052_s9 = smov [#allocation2]  }
  0x1f   : > { %p952_p12 = scmp.ne.s32.totalorder %s1157_s13, %s951_s28  ;;  %s956_s10 = sshll.u32 %s1052_s9, 4  ;;  %s957_s10 = int_to_ptr.vmem [resolvable:$false] %s956_s10 }
  0x20   : > { %s958_s12 = scalar_lea.vmem %s957_s10, 256  ;;  %p959_p11 = scmp.lt.s32.totalorder %s1157_s13, %s957_s10 }
  0x21   : > { %p954_p0 = pnand %p952_p12, %p938_p13  ;;  %p960_p2 = scmp.lt.s32.totalorder %s958_s12, %s951_s28 }
  0x23   : > { %p955_p10 = pneg %p954_p0  ;;  %p961_p3 = por %p960_p2, %p959_p11 }
  0x25   : > { %p962_p4 = pnand %p961_p3, %p955_p10 }
  0x27   : > { %965 = shalt.err (!%p962_p4)
}
  0x28   : > { %869 = dma.hbm_to_vmem [thread:$0]  (!%p1153_p9), %s1147_s11, 128, %s1157_s13, %s240_s15  }
  0x29   : > { %p1347_p1 = scmp.lt.s32.totalorder %s1050_s23, 3  ;;  %p1348_p5 = scmp.ge.s32.totalorder %s1050_s23, 1 }
  0x2a   : > { %s1200_s24 = scalar_lea.hbm %s1338_s1, %s860_s7  ;;  %s267_s26 = scalar_lea.vmem [#allocation4], %s844_s8 }
  0x2b   : > { %p1191_p6 = pnand %p1348_p5, %p1347_p1  ;;  %s280_s27 = sshll.u32 %s267_s26, 4  ;;  %s281_s27 = int_to_ptr.vmem [resolvable:$true] %s280_s27 }
  0x2c   : > { %s264_s11 = scalar_lea.sflag [#allocation5], %s1138_s6  ;;  %s966_s13 = scalar_lea.hbm %s1200_s24, 128 }
  0x2d   : > { %s1349_s16 = scalar_select %p1191_p6, 1, 0 }
  0x2e   : > { %p967_p10 = scmp.ne.s32.totalorder %s1200_s24, %s966_s13  ;;  %s971_s7 = scalar_lea.hbm %s1338_s1, 256 }
  0x2f   : > { %p972_p12 = scmp.lt.u32.totalorder %s1200_s24, %s1338_s1  ;;  %p973_p0 = scmp.lt.u32.totalorder %s971_s7, %s966_s13 }
  0x30   : > { %p969_p11 = pnand %p967_p10, %p938_p13  ;;  %p975_p3 = scmp.lt.u32.totalorder %s966_s13, %s1200_s24 }
  0x31   : > { %p974_p2 = por %p973_p0, %p972_p12 }
  0x32   : > { %p970_p8 = pneg %p969_p11 }
  0x33   : > { %p976_p4 = por %p975_p3, %p974_p2 }
  0x35   : > { %p977_p1 = pnand %p976_p4, %p970_p8 }
  0x37   : > { %980 = shalt.err (!%p977_p1)
}
  0x38   : > { %s981_s6 = scalar_lea.vmem %s281_s27, 128  ;;  %s1053_s8 = smov [#allocation4]  }
  0x39   : > { %p982_p5 = scmp.ne.s32.totalorder %s281_s27, %s981_s6  ;;  %s986_s12 = sshll.u32 %s1053_s8, 4  ;;  %s987_s12 = int_to_ptr.vmem [resolvable:$false] %s986_s12 }
  0x3a   : > { %s988_s17 = scalar_lea.vmem %s987_s12, 256  ;;  %p989_p7 = scmp.lt.s32.totalorder %s281_s27, %s987_s12 }
  0x3b   : > { %p984_p10 = pnand %p982_p5, %p938_p13  ;;  %p990_p6 = scmp.lt.s32.totalorder %s988_s17, %s981_s6 }
  0x3d   : > { %p985_p11 = pneg %p984_p10  ;;  %p991_p0 = por %p990_p6, %p989_p7 }
  0x3f   : > { %p992_p12 = pnand %p991_p0, %p985_p11 }
  0x41   : > { %995 = shalt.err (!%p992_p12)
}
  0x42   : > { %872 = dma.hbm_to_vmem [thread:$0]  (!%p1153_p9), %s1200_s24, 128, %s281_s27, %s264_s11  }
  0x43   : > { %p1350_p8 = scmp.ne.s32.totalorder %s1349_s16, 0 }
  0x44   : > { %s291_s18 = sand.u32 (!%p1350_p8), 1, %s1034_s19   ;;  %p1351_p13 = scmp.ne.s32.totalorder (!%p1350_p8), %s1345_s29, 0 }
  0x45   : > { %289 = sbr.rel (%p1350_p8) target bundleno = 297 (0x129), region = 28  ;;  %s851_s26 = sshll.u32 (!%p1350_p8), %s291_s18, 3 }
  0x46   : > { %s292_s13 = scalar_lea.sflag (!%p1350_p8), [#allocation3], %s291_s18  ;;  %s295_s15 = scalar_lea.vmem (!%p1350_p8), [#allocation2], %s851_s26 }
  0x4c   : > { %1021 = dma.done.wait (%p1351_p13), %s292_s13, 128  }
  0x4d   : > { %1023 = vsyncadd (%p1351_p13), %s292_s13, 4294967168  ;;  %s301_s28 = scalar_lea.sflag [#allocation5], %s291_s18  ;;  %s304_s7 = scalar_lea.vmem [#allocation4], %s851_s26 }
  0x4e   : > { %1025 = dma.done.wait (%p1351_p13), %s301_s28, 128  }
  0x4f   : > { %1027 = vsyncadd (%p1351_p13), %s301_s28, 4294967168  ;;  %p372_p7 = scmp.lt.s32.totalorder %s1042_s21, 1  ;;  %vm405_vm0 = vcmask 0   ;;  %vm416_vm1 = vcmask 1043456   ;;  %v1054_v0 = vmov 0.0   ;;  %v1248_v1 = vld [vmem:[%s295_s15] sm:$0xff]  ;;  %v462_v10 = vlaneseq }
  0x50   : > { %v1250_v2 = vld [vmem:[%s304_s7] sm:$0xff]  ;;  %v1254_v3 = vcombine.high %v1248_v1, %v1248_v1  ;;  %v417_v4 = vsel %vm416_vm1, %v1248_v1, -inf  ;;  %v1055_v12 = vmov 839922192   ;;  %vm407_vm11 = vcmask 3072  }
  0x51   : > { %s1360_s21 = smov (!%p372_p7, %s1042_s21), 1  ;;  %v1260_v5 = vcombine.high %v1250_v2, %v1250_v2  ;;  %v467_v6 = vsel %vm416_vm1, %v1250_v2, -inf  ;;  %v418_v7 = vrot.slane %v417_v4, 4  ;;  %v487_v13 = vunpack.c.l.s4 %v1055_v12 }
  0x52   : > { %s1243_s24 = scalar_lea.vmem %s1339_s2, %s1360_s21  ;;  %v468_v8 = vrot.slane %v467_v6, 4  ;;  %v424_v9 = vsel %vm416_vm1, %v1254_v3, -inf  ;;  %v463_v22 = vshrl.u32 %v462_v10, 7  ;;  %s853_s29 = sshll.u32 %s1360_s21, 2 }
  0x53   : > { %406 = vst.msk [vmem:[%s1243_s24] sm:$0x1] %vm405_vm0, %v1054_v0  ;;  %v474_v11 = vsel %vm416_vm1, %v1260_v5, -inf  ;;  %v419_v14 = vmax.f32 %v417_v4, %v418_v7  ;;  %v425_v15 = vrot.slane %v424_v9, 4  ;;  %v488_v23 = vunpack.c.0.s8 %v487_v13  ;;  %s392_s9 = scalar_lea.vmem %s1341_s4, %s853_s29  ;;  %s400_s8 = scalar_lea.vmem %s1342_s5, %s853_s29 }
  0x54   : > { %v469_v16 = vmax.f32 %v467_v6, %v468_v8  ;;  %v475_v17 = vrot.slane %v474_v11, 4  ;;  %409 = vst.msk [vmem:[%s392_s9] sm:$0xf] %vm407_vm11, %v1054_v0  ;;  %s384_s18 = scalar_lea.vmem %s1340_s3, %s853_s29  ;;  %410 = vst.msk [vmem:[%s400_s8] sm:$0xf] %vm407_vm11, %v1054_v0 }
  0x55   : > { %v420_v18 = vrot.slane %v419_v14, 2  ;;  %v426_v19 = vmax.f32 %v424_v9, %v425_v15  ;;  %v491_v32 = vsub.s32 %v488_v23, %v463_v22  ;;  %408 = vst.msk [vmem:[%s384_s18] sm:$0xf] %vm407_vm11, %v1054_v0 }
  0x56   : > { %v470_v20 = vrot.slane %v469_v16, 2  ;;  %v476_v21 = vmax.f32 %v474_v11, %v475_v17 }
  0x57   : > { %v421_v24 = vmax.f32 %v419_v14, %v420_v18  ;;  %v427_v25 = vrot.slane %v426_v19, 2  ;;  %v492_v39 = vrot.slane %v463_v22, %v491_v32 }
  0x58   : > { %v471_v26 = vmax.f32 %v469_v16, %v470_v20  ;;  %v477_v27 = vrot.slane %v476_v21, 2 }
  0x59   : > { %v422_v28 = vrot.slane %v421_v24, 1  ;;  %v428_v29 = vmax.f32 %v426_v19, %v427_v25 }
  0x5a   : > { %v472_v30 = vrot.slane %v471_v26, 1  ;;  %v478_v31 = vmax.f32 %v476_v21, %v477_v27 }
  0x5b   : > { %v1268_v33 = vmax.f32 %v421_v24, %v422_v28  ;;  %v429_v34 = vrot.slane %v428_v29, 1 }
  0x5c   : > { %v473_v35 = vmax.f32 %v471_v26, %v472_v30  ;;  %v479_v36 = vrot.slane %v478_v31, 1 }
  0x5d   : > { %v1270_v37 = vmax.f32 %v428_v29, %v429_v34 }
  0x5e   : > { %v480_v38 = vmax.f32 %v478_v31, %v479_v36 }
  0x5f   : > { %v433_v40 = vcombine.low %v1268_v33, %v1270_v37 }
  0x60   : > { %v483_v41 = vcombine.low %v473_v35, %v480_v38 }
  0x61   : > { %v435_v42 = vsub.f32 %v1248_v1, %v433_v40 }
  0x62   : > { %vm485_vm2 = vcmp.eq.f32.partialorder %v1250_v2, %v483_v41 }
  0x63   : > { %v493_v43 = vsel %vm485_vm2, %v492_v39, 4  ;;  %v436_v44 = vmul.f32 1.442695, %v435_v42 }
  0x64   : > { %v494_v45 = vcombine.high %v493_v43, %v493_v43  ;;  %v495_v46 = vsel %vm416_vm1, %v493_v43, 2147483647 }
  0x65   : > { %v496_v47 = vrot.slane %v495_v46, 4  ;;  %926 = vpow2.f32 %v436_v44 }
  0x66   : > { %v505_v48 = vsel %vm416_vm1, %v494_v45, 2147483647 }
  0x67   : > { %vm497_vm3 = vcmp.lt.s32.totalorder %v495_v46, %v496_v47  ;;  %v506_v49 = vrot.slane %v505_v48, 4 }
  0x68   : > { %v498_v50 = vsel %vm497_vm3, %v495_v46, %v496_v47 }
  0x69   : > { %v499_v51 = vrot.slane %v498_v50, 2  ;;  %vm507_vm4 = vcmp.lt.s32.totalorder %v505_v48, %v506_v49 }
  0x6a   : > { %v508_v52 = vsel %vm507_vm4, %v505_v48, %v506_v49 }
  0x6b   : > { %vm500_vm5 = vcmp.lt.s32.totalorder %v498_v50, %v499_v51  ;;  %v509_v53 = vrot.slane %v508_v52, 2 }
  0x6c   : > { %v501_v54 = vsel %vm500_vm5, %v498_v50, %v499_v51  ;;  %v577_v51 = vsel %vm416_vm1, %v1250_v2, 0.0 }
  0x6d   : > { %v502_v55 = vrot.slane %v501_v54, 1  ;;  %vm510_vm6 = vcmp.lt.s32.totalorder %v508_v52, %v509_v53 }
  0x6e   : > { %v511_v56 = vsel %vm510_vm6, %v508_v52, %v509_v53 }
  0x6f   : > { %vm503_vm7 = vcmp.lt.s32.totalorder %v501_v54, %v502_v55  ;;  %v512_v57 = vrot.slane %v511_v56, 1  ;;  %v927_v58 = vpop.eup %926 }
  0x70   : > { %v504_v59 = vsel %vm503_vm7, %v501_v54, %v502_v55  ;;  %v439_v60 = vcombine.high %v927_v58, %v927_v58  ;;  %v441_v61 = vsel %vm416_vm1, %v927_v58, 0.0 }
  0x71   : > { %vm513_vm8 = vcmp.lt.s32.totalorder %v511_v56, %v512_v57  ;;  %vm515_vm9 = vcmp.eq.s32.totalorder %v463_v22, %v504_v59  ;;  %v442_v62 = vrot.slane %v441_v61, 4 }
  0x72   : > { %v514_v63 = vsel %vm513_vm8, %v511_v56, %v512_v57  ;;  %v856_v4 = vsel %vm515_vm9, 1.0, %v1054_v0  ;;  %v448_v6 = vsel %vm416_vm1, %v439_v60, 0.0 }
  0x73   : > { %vm516_vm10 = vcmp.eq.s32.totalorder %v463_v22, %v514_v63  ;;  %v521_v7 = vmul.f32 %v856_v4, %v1248_v1  ;;  %v443_v8 = vadd.f32 %v442_v62, %v441_v61  ;;  %v449_v9 = vrot.slane %v448_v6, 4  ;;  %v552_v61 = vld [vmem:[%s384_s18] sm:$0xf] }
  0x74   : > { %v857_v10 = vsel %vm516_vm10, 1.0, %v1054_v0  ;;  %v576_v63 = vld [vmem:[%s400_s8] sm:$0xf] }
  0x75   : > { %v522_v11 = vmul.f32 %v857_v10, %v1254_v3  ;;  %v523_v12 = vsel %vm416_vm1, %v521_v7, 0.0  ;;  %v444_v13 = vrot.slane %v443_v8, 2  ;;  %v450_v14 = vadd.f32 %v449_v9, %v448_v6 }
  0x76   : > { %v524_v15 = vrot.slane %v523_v12, 4 }
  0x77   : > { %v530_v16 = vsel %vm416_vm1, %v522_v11, 0.0  ;;  %v445_v17 = vadd.f32 %v444_v13, %v443_v8  ;;  %v451_v18 = vrot.slane %v450_v14, 2 }
  0x78   : > { %v531_v19 = vrot.slane %v530_v16, 4  ;;  %v525_v22 = vadd.f32 %v524_v15, %v523_v12 }
  0x79   : > { %v446_v20 = vrot.slane %v445_v17, 1  ;;  %v452_v21 = vadd.f32 %v451_v18, %v450_v14 }
  0x7a   : > { %v532_v1 = vadd.f32 %v531_v19, %v530_v16  ;;  %v526_v26 = vrot.slane %v525_v22, 2 }
  0x7b   : > { %v447_v23 = vadd.f32 %v446_v20, %v445_v17  ;;  %v453_v24 = vrot.slane %v452_v21, 1 }
  0x7c   : > { %v533_v3 = vrot.slane %v532_v1, 2  ;;  %v527_v27 = vadd.f32 %v526_v26, %v525_v22 }
  0x7d   : > { %v454_v25 = vadd.f32 %v453_v24, %v452_v21  ;;  %928 = vrcp.f32 %v447_v23 }
  0x7e   : > { %930 = vlog2.f32 %v447_v23  ;;  %v534_v28 = vadd.f32 %v533_v3, %v532_v1  ;;  %v528_v29 = vrot.slane %v527_v27, 1 }
  0x7f   : > { %932 = vlog2.f32 %v454_v25 }
  0x80   : > { %934 = vrcp.f32 %v454_v25  ;;  %v535_v30 = vrot.slane %v534_v28, 1  ;;  %v529_v35 = vadd.f32 %v528_v29, %v527_v27 }
  0x82   : > { %v536_v39 = vadd.f32 %v535_v30, %v534_v28 }
  0x87   : > { %v929_v31 = vpop.eup %928 }
  0x88   : > { %v931_v32 = vpop.eup %930 }
  0x89   : > { %v933_v34 = vpop.eup %932  ;;  %v538_v36 = vmul.f32 0.6931472, %v931_v32 }
  0x8a   : > { %v935_v38 = vpop.eup %934  ;;  %v540_v40 = vmul.f32 0.6931472, %v933_v34 }
  0x8b   : > { %v541_v41 = vadd.f32 %v538_v36, %v1268_v33  ;;  %v459_v42 = vcombine.low %v929_v31, %v935_v38  ;;  %v578_v33 = vsel %vm416_vm1, %v1260_v5, 0.0 }
  0x8c   : > { %v542_v43 = vadd.f32 %v540_v40, %v1270_v37  ;;  %v579_v56 = vadd.f32 %v578_v33, %v577_v51 }
  0x8d   : > { %v543_v44 = vsub.f32 %v541_v41, %v529_v35  ;;  %v461_v45 = vmul.f32 %v927_v58, %v459_v42  ;;  %v565_v58 = vld [vmem:[%s392_s9] sm:$0xf] }
  0x8e   : > { %v544_v46 = vsub.f32 %v542_v43, %v536_v39 }
  0x8f   : > { %v567_v47 = vcombine.high %v461_v45, %v461_v45  ;;  %v569_v48 = vsel %vm416_vm1, %v461_v45, 0.0  ;;  %v553_v49 = vmul.f32 %v461_v45, %v1250_v2  ;;  %v545_v2 = vld [vmem:[%s1243_s24] sm:$0x1] }
  0x90   : > { %v546_v50 = vadd.f32 %v544_v46, %v543_v44 }
  0x91   : > { %v570_v52 = vsel %vm416_vm1, %v567_v47, 0.0  ;;  %v555_v53 = vcombine.high %v553_v49, %v553_v49  ;;  %v557_v37 = vsel %vm416_vm1, %v553_v49, 0.0 }
  0x92   : > { %547 = vadd.xlane.f32.xlu0 %v546_v50  ;;  %v571_v54 = vadd.f32 %v570_v52, %v569_v48 }
  0x93   : > { %v558_v55 = vsel %vm416_vm1, %v555_v53, 0.0 }
  0x94   : > { %572 = vadd.xlane.f32.xlu1 %v571_v54  ;;  %v559_v57 = vadd.f32 %v558_v55, %v557_v37 }
  0x96   : > { %560 = vadd.xlane.f32.xlu0 %v559_v57 }
  0x98   : > { %580 = vadd.xlane.f32.xlu1 %v579_v56 }
 0x11f   : > { %v548_v5 = vpop.xlane.xlu0 %547 }
 0x120   : > { %v549_v59 = vadd.f32 %v548_v5, %v545_v2 }
 0x121   : > { %v573_v60 = vpop.xlane.xlu1 %572 }
 0x122   : > { %551 = vst.msk [vmem:[%s1243_s24] sm:$0x1] %vm405_vm0, %v549_v59  ;;  %v574_v62 = vadd.f32 %v573_v60, %v565_v58 }
 0x123   : > { %v561_v4 = vpop.xlane.xlu0 %560 }
 0x124   : > { %575 = vst.msk [vmem:[%s392_s9] sm:$0xf] %vm407_vm11, %v574_v62  ;;  %v562_v6 = vadd.f32 %v561_v4, %v552_v61 }
 0x125   : > { %v581_v7 = vpop.xlane.xlu1 %580 }
 0x126   : > { %v582_v8 = vadd.f32 %v581_v7, %v576_v63  ;;  %564 = vst.msk [vmem:[%s384_s18] sm:$0xf] %vm407_vm11, %v562_v6 }
 0x128   : > { %583 = vst.msk [vmem:[%s400_s8] sm:$0xf] %vm407_vm11, %v582_v8 }
 0x129 PF: > { %s22_s23 = sadd.s32 1, %s1050_s23   ;;  %s1352_s18 = smov %s1034_s19 }
 0x12a   : > { %p19_p9 = scmp.ge.s32.totalorder %s22_s23, 4   ;;  %s1353_s19 = smov %s1038_s20 }
 0x12b   : > { %s1354_s20 = smov %s1135_s30  ;;  %s1355_s21 = smov %s1046_s22 }
 0x12c   : > { %s1356_s22 = smov %s1358_s25  ;;  %21 = sbr.rel (!%p19_p9) target bundleno = 6 (0x6), region = 121 }
 0x133   :  { %675 = vsyncpa [#allocation3], 1 }
 0x134   :  { %677 = vsyncpa [#allocation3 + $0x1], 1 }
 0x135   :  { %678 = vsyncpa [#allocation5], 1 }
 0x136   :  { %680 = vsyncpa [#allocation5 + $0x1], 1 }

</bundles_post_ra>
